<compile_context>
chip_gen: v7x
topology: tpu7x:2x2x1
jax: 0.10.0
libtpu: 0.0.40
codegen_flags: <defaults>
</compile_context>

<pallas_src>
import functools

import jax
import jax.numpy as jnp
from jax.experimental import pallas as pl
from jax.experimental.pallas import tpu as pltpu


# ----------------------------- kernel ---------------------------------------

def ae_kernel(x_ref,
              w1_ref, b1_ref,
              w2_ref, b2_ref,
              w3_ref, b3_ref,
              w4_ref, b4_ref,
              out_ref, *, compute_dtype, approx_sigmoid):
    cdt = compute_dtype

    # x arrives as float32; cast to the MXU operand dtype in-kernel (free VPU
    # filler in this memory-bound kernel, saves a full HBM pass in the wrapper).
    x = x_ref[...].astype(cdt)

    # Encoder: Linear -> ReLU -> Linear -> ReLU   (f32 accumulation on MXU)
    h = jnp.dot(x, w1_ref[...], preferred_element_type=jnp.float32) + b1_ref[...]
    h = jnp.maximum(h, 0.0).astype(cdt)
    z = jnp.dot(h, w2_ref[...], preferred_element_type=jnp.float32) + b2_ref[...]
    z = jnp.maximum(z, 0.0).astype(cdt)

    # Decoder: Linear -> ReLU -> Linear -> Sigmoid
    h = jnp.dot(z, w3_ref[...], preferred_element_type=jnp.float32) + b3_ref[...]
    h = jnp.maximum(h, 0.0).astype(cdt)
    y = jnp.dot(h, w4_ref[...], preferred_element_type=jnp.float32) + b4_ref[...]

    if approx_sigmoid:
        # exp on the EUP + approximate reciprocal (also EUP) -> no VPU divide.
        s = pl.reciprocal(1.0 + jnp.exp(-y), approx=True)
    else:
        s = jax.nn.sigmoid(y)
    out_ref[...] = s.astype(out_ref.dtype)


# ------------------------ one-time parameter prep ---------------------------

def _block_diag(w, p):
    """[fi, fo] -> block-diagonal [p*fi, p*fo] (p copies of w on the diagonal)."""
    if p == 1:
        return w
    fi, fo = w.shape
    out = jnp.zeros((p * fi, p * fo), w.dtype)
    for k in range(p):
        out = out.at[k * fi:(k + 1) * fi, k * fo:(k + 1) * fo].set(w)
    return out


def prepare_params(params, *, compute_dtype=jnp.bfloat16):
    """One-time parameter preparation (do NOT call per forward pass).

    * Casts weights to the MXU operand dtype (biases stay f32: they are added
      to the f32 accumulator).
    * If n_in < 128 and 128 % n_in == 0, expands weights into block-diagonal
      form with pack = 128 // n_in and tiles the biases, so the kernel can
      consume `pack` batch rows per lane-dense (multiple-of-128) I/O row.
    """
    n_in = params["w1"].shape[0]
    pack = 128 // n_in if (n_in < 128 and 128 % n_in == 0) else 1

    prep = {"pack": pack, "n_in": n_in, "compute_dtype": compute_dtype}
    for k in ("1", "2", "3", "4"):
        prep["w" + k] = _block_diag(params["w" + k], pack).astype(compute_dtype)
        prep["b" + k] = jnp.tile(params["b" + k], (1, pack)).astype(jnp.float32)
    return prep


# ------------------------------ wrapper --------------------------------------

def _choose_tb(B, unit, max_tb):
    """Batch tile (in un-packed rows): a multiple of `unit`, <= max_tb, that
    divides B when possible (avoids a jnp.pad HBM pass) and leaves >= 2
    (preferably >= 4) grid steps so the 'parallel' batch axis shards across
    TensorCores (v7x) and the x/out DMAs pipeline against compute."""
    if B < 2 * unit:
        return unit
    steps = 4 if B >= 8 * unit else 2
    cap = max(unit, min(max_tb, (B // steps) // unit * unit))
    for t in range(cap, unit - 1, -unit):
        if B % t == 0:
            return t
    return cap  # ragged batch: fall back to padding in ae_forward


def ae_forward(x, prep, *, max_tb=1024, out_dtype=jnp.float32,
               approx_sigmoid=None):
    """x: [B, n_in] float32 (passed through un-cast; the kernel casts).
    prep: output of prepare_params(). Returns [B, n_in] in `out_dtype`
    (sigmoid outputs), matching the PyTorch module's forward pass."""
    B, n_in = x.shape
    assert n_in == prep["n_in"], "prepare_params was built for a different n_in"
    pack = prep["pack"]
    cdt = prep["compute_dtype"]
    if approx_sigmoid is None:
        approx_sigmoid = cdt != jnp.float32

    d_in = n_in * pack     # lane width of packed I/O rows (multiple of 128 if pack>1)
    unit = 8 * pack        # row granularity keeping packed sublane counts % 8 == 0
    tb = _choose_tb(B, unit, max_tb)
    b_pad = pl.cdiv(B, tb) * tb
    if b_pad != B:         # only when no divisor tile exists
        x = jnp.pad(x, ((0, b_pad - B), (0, 0)))

    # Free (metadata) row-major reshape: `pack` batch rows per lane-dense row.
    xp = x.reshape(b_pad // pack, d_in)
    trows = tb // pack
    grid = (b_pad // tb,)

    w1, b1 = prep["w1"], prep["b1"]
    w2, b2 = prep["w2"], prep["b2"]
    w3, b3 = prep["w3"], prep["b3"]
    w4, b4 = prep["w4"], prep["b4"]

    x_spec = pl.BlockSpec((trows, d_in), lambda i: (i, 0))
    out_spec = pl.BlockSpec((trows, d_in), lambda i: (i, 0))

    def whole(arr):        # weights/biases: one DMA, VMEM-resident across steps
        return pl.BlockSpec(arr.shape, lambda i: (0, 0))

    in_specs = [x_spec,
                whole(w1), whole(b1), whole(w2), whole(b2),
                whole(w3), whole(b3), whole(w4), whole(b4)]

    hidden_p = w1.shape[1]
    latent_p = w2.shape[1]
    flops = 2 * (b_pad // pack) * (d_in * hidden_p + hidden_p * latent_p
                                   + latent_p * hidden_p + hidden_p * d_in)
    weight_bytes = sum(int(a.size) * a.dtype.itemsize
                       for a in (w1, b1, w2, b2, w3, b3, w4, b4))
    bytes_accessed = (int(xp.size) * xp.dtype.itemsize               # f32 x stream
                      + b_pad * n_in * jnp.dtype(out_dtype).itemsize  # out stream
                      + weight_bytes)
    cost = pl.CostEstimate(flops=flops,
                           transcendentals=b_pad * n_in,             # sigmoid exp
                           bytes_accessed=bytes_accessed)

    kernel = functools.partial(ae_kernel, compute_dtype=cdt,
                               approx_sigmoid=approx_sigmoid)

    out = pl.pallas_call(
        kernel,
        out_shape=jax.ShapeDtypeStruct((b_pad // pack, d_in), out_dtype),
        grid=grid,
        in_specs=in_specs,
        out_specs=out_spec,
        compiler_params=pltpu.CompilerParams(
            dimension_semantics=("parallel",)),
        cost_estimate=cost,
    )(xp, w1, b1, w2, b2, w3, b3, w4, b4)

    # Free reshape back to [b_pad, n_in]; drop padded rows (if any).
    return out.reshape(b_pad, n_in)[:B]


# ------------------------- init & reference ----------------------------------

def init_params(key, n_in, n_latent=32, hidden=128):
    """Deterministic init. Weights stored as (in, out); biases as (1, out)."""
    ks = jax.random.split(key, 8)

    def linear(kw, kb, fan_in, fan_out):
        # Mimic PyTorch's default uniform(-1/sqrt(fan_in), 1/sqrt(fan_in)).
        bound = 1.0 / jnp.sqrt(fan_in)
        w = jax.random.uniform(kw, (fan_in, fan_out), jnp.float32, -bound, bound)
        b = jax.random.uniform(kb, (1, fan_out), jnp.float32, -bound, bound)
        return w, b

    w1, b1 = linear(ks[0], ks[1], n_in, hidden)
    w2, b2 = linear(ks[2], ks[3], hidden, n_latent)
    w3, b3 = linear(ks[4], ks[5], n_latent, hidden)
    w4, b4 = linear(ks[6], ks[7], hidden, n_in)
    return {"w1": w1, "b1": b1, "w2": w2, "b2": b2,
            "w3": w3, "b3": b3, "w4": w4, "b4": b4}


def ae_reference(x, p):
    """Pure-JAX f32 reference for correctness checks."""
    h = jnp.maximum(x @ p["w1"] + p["b1"], 0.0)
    z = jnp.maximum(h @ p["w2"] + p["b2"], 0.0)
    h = jnp.maximum(z @ p["w3"] + p["b3"], 0.0)
    return jax.nn.sigmoid(h @ p["w4"] + p["b4"])


# --------------------------------- demo ---------------------------------------

if __name__ == "__main__":
    key = jax.random.PRNGKey(0)
    k_x, k_p = jax.random.split(key)

    B, n_in, n_latent = 256, 64, 32
    x = jax.random.uniform(k_x, (B, n_in), jnp.float32)   # "image-like" in [0,1)
    params = init_params(k_p, n_in, n_latent)
    ref = ae_reference(x, params)

    # 1) f32 compute path (exact sigmoid) — validates math / packing / tiling.
    prep_f32 = prepare_params(params, compute_dtype=jnp.float32)
    out_f32 = jax.block_until_ready(ae_forward(x, prep_f32))
    assert out_f32.shape == (B, n_in) and out_f32.dtype == jnp.float32
    assert jnp.allclose(out_f32, ref, atol=1e-5, rtol=1e-5), "f32 mismatch vs reference"

    # 2) bf16 MXU-operand path (f32 accumulation, approx-reciprocal sigmoid).
    prep_bf16 = prepare_params(params, compute_dtype=jnp.bfloat16)
    out_bf16 = jax.block_until_ready(ae_forward(x, prep_bf16))
    assert out_bf16.shape == (B, n_in) and out_bf16.dtype == jnp.float32
    assert jnp.allclose(out_bf16, ref, atol=2e-2, rtol=2e-2), "bf16 mismatch vs reference"

    # 3) bf16 output stream (halves the dominant write stream).
    out_bf16_o = jax.block_until_ready(
        ae_forward(x, prep_bf16, out_dtype=jnp.bfloat16))
    assert out_bf16_o.shape == (B, n_in) and out_bf16_o.dtype == jnp.bfloat16
    assert jnp.allclose(out_bf16_o.astype(jnp.float32), ref, atol=2e-2, rtol=2e-2), \
        "bf16-output mismatch vs reference"

    print("KERNEL_OK")
</pallas_src>

<mosaic_0001>
module attributes {stable_mosaic.version = 11 : i64} {
  func.func @ae_kernel(%arg0: i32, %arg1: memref<32x128xf32, #tpu.memory_space<vmem>>, %arg2: memref<128x256xf32, #tpu.memory_space<vmem>>, %arg3: memref<1x256xf32, #tpu.memory_space<vmem>>, %arg4: memref<256x64xf32, #tpu.memory_space<vmem>>, %arg5: memref<1x64xf32, #tpu.memory_space<vmem>>, %arg6: memref<64x256xf32, #tpu.memory_space<vmem>>, %arg7: memref<1x256xf32, #tpu.memory_space<vmem>>, %arg8: memref<256x128xf32, #tpu.memory_space<vmem>>, %arg9: memref<1x128xf32, #tpu.memory_space<vmem>>, %arg10: memref<32x128xf32, #tpu.memory_space<vmem>>) attributes {dimension_semantics = [#tpu.dimension_semantics<parallel>], iteration_bounds = array<i64: 4>, scalar_prefetch = 0 : i64, scratch_operands = 0 : i64, tpu.core_type = #tpu.core_type<tc>, window_params = [{transform_indices = @transform_0, window_bounds = array<i64: 32, 128>}, {pipeline_mode = #tpu.pipeline_mode<synchronous>, transform_indices = @transform_1, window_bounds = array<i64: 128, 256>}, {pipeline_mode = #tpu.pipeline_mode<synchronous>, transform_indices = @transform_2, window_bounds = array<i64: 1, 256>}, {pipeline_mode = #tpu.pipeline_mode<synchronous>, transform_indices = @transform_3, window_bounds = array<i64: 256, 64>}, {pipeline_mode = #tpu.pipeline_mode<synchronous>, transform_indices = @transform_4, window_bounds = array<i64: 1, 64>}, {pipeline_mode = #tpu.pipeline_mode<synchronous>, transform_indices = @transform_5, window_bounds = array<i64: 64, 256>}, {pipeline_mode = #tpu.pipeline_mode<synchronous>, transform_indices = @transform_6, window_bounds = array<i64: 1, 256>}, {pipeline_mode = #tpu.pipeline_mode<synchronous>, transform_indices = @transform_7, window_bounds = array<i64: 256, 128>}, {pipeline_mode = #tpu.pipeline_mode<synchronous>, transform_indices = @transform_8, window_bounds = array<i64: 1, 128>}, {transform_indices = @transform_9, window_bounds = array<i64: 32, 128>}]} {
    %c0 = arith.constant 0 : index
    %c0_0 = arith.constant 0 : index
    %0 = vector.load %arg1[%c0, %c0_0] : memref<32x128xf32, #tpu.memory_space<vmem>>, vector<32x128xf32>
    %c0_1 = arith.constant 0 : index
    %c0_2 = arith.constant 0 : index
    %1 = vector.load %arg2[%c0_1, %c0_2] : memref<128x256xf32, #tpu.memory_space<vmem>>, vector<128x256xf32>
    %cst = arith.constant dense<0.000000e+00> : vector<32x256xf32>
    %2 = tpu.matmul %0, %1, %cst {dimension_numbers = #tpu.dot_dimension_numbers<[1], [0], [0], [1], [0, 0, 1, 1], [], []>} : vector<32x128xf32>, vector<128x256xf32>, vector<32x256xf32> -> vector<32x256xf32>
    %c0_3 = arith.constant 0 : index
    %c0_4 = arith.constant 0 : index
    %3 = vector.load %arg3[%c0_3, %c0_4] : memref<1x256xf32, #tpu.memory_space<vmem>>, vector<1x256xf32>
    %4 = vector.broadcast %3 : vector<1x256xf32> to vector<32x256xf32>
    %5 = arith.addf %2, %4 : vector<32x256xf32>
    %cst_5 = arith.constant 0.000000e+00 : f32
    %6 = vector.broadcast %cst_5 : f32 to vector<32x256xf32>
    %7 = arith.maximumf %5, %6 : vector<32x256xf32>
    %c0_6 = arith.constant 0 : index
    %c0_7 = arith.constant 0 : index
    %8 = vector.load %arg4[%c0_6, %c0_7] : memref<256x64xf32, #tpu.memory_space<vmem>>, vector<256x64xf32>
    %cst_8 = arith.constant dense<0.000000e+00> : vector<32x64xf32>
    %9 = tpu.matmul %7, %8, %cst_8 {dimension_numbers = #tpu.dot_dimension_numbers<[1], [0], [0], [1], [0, 0, 1, 1], [], []>} : vector<32x256xf32>, vector<256x64xf32>, vector<32x64xf32> -> vector<32x64xf32>
    %c0_9 = arith.constant 0 : index
    %c0_10 = arith.constant 0 : index
    %10 = vector.load %arg5[%c0_9, %c0_10] : memref<1x64xf32, #tpu.memory_space<vmem>>, vector<1x64xf32>
    %11 = vector.broadcast %10 : vector<1x64xf32> to vector<32x64xf32>
    %12 = arith.addf %9, %11 : vector<32x64xf32>
    %cst_11 = arith.constant 0.000000e+00 : f32
    %13 = vector.broadcast %cst_11 : f32 to vector<32x64xf32>
    %14 = arith.maximumf %12, %13 : vector<32x64xf32>
    %c0_12 = arith.constant 0 : index
    %c0_13 = arith.constant 0 : index
    %15 = vector.load %arg6[%c0_12, %c0_13] : memref<64x256xf32, #tpu.memory_space<vmem>>, vector<64x256xf32>
    %cst_14 = arith.constant dense<0.000000e+00> : vector<32x256xf32>
    %16 = tpu.matmul %14, %15, %cst_14 {dimension_numbers = #tpu.dot_dimension_numbers<[1], [0], [0], [1], [0, 0, 1, 1], [], []>} : vector<32x64xf32>, vector<64x256xf32>, vector<32x256xf32> -> vector<32x256xf32>
    %c0_15 = arith.constant 0 : index
    %c0_16 = arith.constant 0 : index
    %17 = vector.load %arg7[%c0_15, %c0_16] : memref<1x256xf32, #tpu.memory_space<vmem>>, vector<1x256xf32>
    %18 = vector.broadcast %17 : vector<1x256xf32> to vector<32x256xf32>
    %19 = arith.addf %16, %18 : vector<32x256xf32>
    %cst_17 = arith.constant 0.000000e+00 : f32
    %20 = vector.broadcast %cst_17 : f32 to vector<32x256xf32>
    %21 = arith.maximumf %19, %20 : vector<32x256xf32>
    %c0_18 = arith.constant 0 : index
    %c0_19 = arith.constant 0 : index
    %22 = vector.load %arg8[%c0_18, %c0_19] : memref<256x128xf32, #tpu.memory_space<vmem>>, vector<256x128xf32>
    %cst_20 = arith.constant dense<0.000000e+00> : vector<32x128xf32>
    %23 = tpu.matmul %21, %22, %cst_20 {dimension_numbers = #tpu.dot_dimension_numbers<[1], [0], [0], [1], [0, 0, 1, 1], [], []>} : vector<32x256xf32>, vector<256x128xf32>, vector<32x128xf32> -> vector<32x128xf32>
    %c0_21 = arith.constant 0 : index
    %c0_22 = arith.constant 0 : index
    %24 = vector.load %arg9[%c0_21, %c0_22] : memref<1x128xf32, #tpu.memory_space<vmem>>, vector<1x128xf32>
    %25 = vector.broadcast %24 : vector<1x128xf32> to vector<32x128xf32>
    %26 = arith.addf %23, %25 : vector<32x128xf32>
    %27 = arith.negf %26 : vector<32x128xf32>
    %28 = math.exp %27 : vector<32x128xf32>
    %cst_23 = arith.constant 1.000000e+00 : f32
    %29 = vector.broadcast %cst_23 : f32 to vector<32x128xf32>
    %30 = arith.addf %29, %28 : vector<32x128xf32>
    %31 = arith.divf %29, %30 : vector<32x128xf32>
    %c0_24 = arith.constant 0 : index
    %c0_25 = arith.constant 0 : index
    %32 = vector.load %arg10[%c0_24, %c0_25] : memref<32x128xf32, #tpu.memory_space<vmem>>, vector<32x128xf32>
    tpu.vector_store %arg10[%c0_24, %c0_25], %31 {strides = array<i32>} : memref<32x128xf32, #tpu.memory_space<vmem>>, vector<32x128xf32>,
    return
  }
  func.func @transform_0(%arg0: i32) -> (i32, i32) {
    %c0_i32 = arith.constant 0 : i32
    %c0_i32_0 = arith.constant 0 : i32
    return %arg0, %c0_i32 : i32, i32
  }
  func.func @transform_1(%arg0: i32) -> (i32, i32) {
    %c0_i32 = arith.constant 0 : i32
    %c0_i32_0 = arith.constant 0 : i32
    %c0_i32_1 = arith.constant 0 : i32
    return %c0_i32, %c0_i32_0 : i32, i32
  }
  func.func @transform_2(%arg0: i32) -> (i32, i32) {
    %c0_i32 = arith.constant 0 : i32
    %c0_i32_0 = arith.constant 0 : i32
    %c0_i32_1 = arith.constant 0 : i32
    return %c0_i32, %c0_i32_0 : i32, i32
  }
  func.func @transform_3(%arg0: i32) -> (i32, i32) {
    %c0_i32 = arith.constant 0 : i32
    %c0_i32_0 = arith.constant 0 : i32
    %c0_i32_1 = arith.constant 0 : i32
    return %c0_i32, %c0_i32_0 : i32, i32
  }
  func.func @transform_4(%arg0: i32) -> (i32, i32) {
    %c0_i32 = arith.constant 0 : i32
    %c0_i32_0 = arith.constant 0 : i32
    %c0_i32_1 = arith.constant 0 : i32
    return %c0_i32, %c0_i32_0 : i32, i32
  }
  func.func @transform_5(%arg0: i32) -> (i32, i32) {
    %c0_i32 = arith.constant 0 : i32
    %c0_i32_0 = arith.constant 0 : i32
    %c0_i32_1 = arith.constant 0 : i32
    return %c0_i32, %c0_i32_0 : i32, i32
  }
  func.func @transform_6(%arg0: i32) -> (i32, i32) {
    %c0_i32 = arith.constant 0 : i32
    %c0_i32_0 = arith.constant 0 : i32
    %c0_i32_1 = arith.constant 0 : i32
    return %c0_i32, %c0_i32_0 : i32, i32
  }
  func.func @transform_7(%arg0: i32) -> (i32, i32) {
    %c0_i32 = arith.constant 0 : i32
    %c0_i32_0 = arith.constant 0 : i32
    %c0_i32_1 = arith.constant 0 : i32
    return %c0_i32, %c0_i32_0 : i32, i32
  }
  func.func @transform_8(%arg0: i32) -> (i32, i32) {
    %c0_i32 = arith.constant 0 : i32
    %c0_i32_0 = arith.constant 0 : i32
    %c0_i32_1 = arith.constant 0 : i32
    return %c0_i32, %c0_i32_0 : i32, i32
  }
  func.func @transform_9(%arg0: i32) -> (i32, i32) {
    %c0_i32 = arith.constant 0 : i32
    %c0_i32_0 = arith.constant 0 : i32
    return %arg0, %c0_i32 : i32, i32
  }
}

</mosaic_0001>

<bundles_post_ra>
// kernel: tpu_custom_call.1
= control target key start
LH: loop header
LB: loop body
LE: loop exit
PB: predicated region body
PF: predicated region fallthrough
CT: control target
= control target key end

     0   :  { %14 = vsyncpa [#allocation3], 0  ;;  %s1935_s0 = inlined_call_operand.vmem [shape: f32[128,128], index: 0, kind: input, shape index: {}]   ;;  %s1936_s1 = inlined_call_operand.vmem [shape: f32[128,256], index: 1, kind: input, shape index: {}]   ;;  %s1937_s2 = inlined_call_operand.vmem [shape: f32[1,256], index: 2, kind: input, shape index: {}]   ;;  %s1938_s3 = inlined_call_operand.vmem [shape: f32[256,64], index: 3, kind: input, shape index: {}]   ;;  %s1939_s4 = inlined_call_operand.vmem [shape: f32[1,64], index: 4, kind: input, shape index: {}]   ;;  %s1940_s5 = inlined_call_operand.hbm [shape: f32[64,256], index: 5, kind: input, shape index: {}]   ;;  %s1941_s6 = inlined_call_operand.vmem [shape: f32[1,256], index: 6, kind: input, shape index: {}]   ;;  %s1942_s7 = inlined_call_operand.hbm [shape: f32[256,128], index: 7, kind: input, shape index: {}]   ;;  %s1943_s8 = inlined_call_operand.vmem [shape: f32[1,128], index: 8, kind: input, shape index: {}]   ;;  %s1944_s9 = inlined_call_operand.hbm [shape: f32[128,128], index: 9, kind: output, shape index: {}]  }
   0x1   :  { %15 = vsyncpa [#allocation6], 0 }
   0x2   :  { %16 = vsyncpa [#allocation4], 0 }
   0x3   :  { %18 = vsyncpa [#allocation4 + $0x1], 0  ;;  %s1523_s30 = smov 0   ;;  %s1525_s10 = smov 0  }
   0x4   :  { %s1527_s11 = smov 0   ;;  %s1529_s12 = smov 0  }
   0x5 LB: > { %1951 = sst [smem:[#allocation11_spill]] %s1457_s11  ;;  %s1544_s13 = sadd.s32 4294967295, %s1461_s12   ;;  %s1461_s12 = sphi %s1529_s12, %s1966_s12   ;;  %s1457_s11 = sphi %s1527_s11, %s1968_s11   ;;  %s1453_s10 = sphi %s1525_s10, %s1970_s10   ;;  %s1449_s30 = sphi %s1523_s30, %s1969_s30  }
   0x6   : > { %s1025_s14 = sadd.s32 4294967294, %s1461_s12   ;;  %s1548_s15 = sadd.s32 1, %s1461_s12  }
   0x7   : > { %1952 = sst [smem:[#allocation12_spill]] %s1548_s15  ;;  %s225_s16 = sadd.s32 1, %s1457_s11 }
   0x8   : > { %s222_s17 = ssub.s32 %s1461_s12, %s1548_s15  ;;  %p235_p0 = scmp.ne.s32.totalorder %s1457_s11, %s1453_s10 }
   0x9   : > { %p223_p1 = scmp.eq.s32.totalorder %s222_s17, 0  ;;  %p236_p2 = scmp.eq.s32.totalorder %s1544_s13, 3 }
   0xa   : > { %p241_p3 = scmp.ne.s32.totalorder %s1453_s10, %s1449_s30  ;;  %p242_p4 = scmp.eq.s32.totalorder %s1025_s14, 3 }
   0xb   : > { %s1559_s18 = scalar_select %p223_p1, %s1457_s11, %s225_s16  }
   0xc   : > { %p1561_p5 = por %p236_p2, %p235_p0  ;;  %p1565_p6 = por %p242_p4, %p241_p3 }
   0xd   : > { %1953 = sst [smem:[#allocation13_spill]] %s1559_s18  ;;  %p1026_p7 = scmp.ge.s32.totalorder %s1461_s12, 1 }
   0xe   : > { %s1954_s19 = scalar_select %p1561_p5, 1, 0 }
   0xf   : > { %s1955_s20 = scalar_select %p1565_p6, 1, 0 }
  0x10   : > { %p249_p8 = scmp.lt.s32.totalorder %s1461_s12, 5  ;;  %p1945_p9 = scmp.eq.s32.totalorder %s1544_s13, 0 }
  0x11   : > { %s1463_s22 = smov [#allocation2]   ;;  %s1464_s25 = smov [#allocation5]  }
  0x12   : > { %p1572_p10 = pnand %p1026_p7, %p249_p8  ;;  %s273_s23 = sshll.u32 %s1463_s22, 4  ;;  %s274_s23 = int_to_ptr.vmem [resolvable:$true] %s273_s23 }
  0x13   : > { %s289_s26 = sshll.u32 %s1464_s25, 4  ;;  %s1335_s29 = scalar_lea.hbm %s1940_s5, 2048  ;;  %s1584_s26 = int_to_ptr.vmem [resolvable:$true] %s289_s26 }
  0x14   : > { %s1956_s21 = scalar_select %p1572_p10, 1, 0 }
  0x15   : > { %p1262_p11 = pneg %p1572_p10  ;;  %p1336_p13 = scmp.ne.s32.totalorder %s1940_s5, %s1335_s29 }
  0x16   : > { %p1342_p3 = scmp.lt.u32.totalorder %s1335_s29, %s1940_s5 }
  0x17   : > { %p1580_p12 = pnand %p1945_p9, %p1262_p11 }
  0x19   : > { %p1337_p0 = pneg %p1580_p12 }
  0x1b   : > { %p1338_p1 = pnand %p1337_p0, %p1336_p13 }
  0x1d   : > { %p1339_p2 = pneg %p1338_p1 }
  0x1f   : > { %p1344_p4 = pnand %p1342_p3, %p1339_p2 }
  0x21   : > { %1347 = shalt.err (!%p1344_p4)
}
  0x22   : > { %s1348_s25 = scalar_lea.vmem %s274_s23, 2048  ;;  %p1356_p9 = scmp.lt.s32.totalorder %s274_s23, %s274_s23 }
  0x23   : > { %p1349_p7 = scmp.ne.s32.totalorder %s274_s23, %s1348_s25  ;;  %p1357_p6 = scmp.lt.s32.totalorder %s1348_s25, %s1348_s25 }
  0x25   : > { %p1351_p8 = pnand %p1349_p7, %p1337_p0  ;;  %p1358_p5 = por %p1357_p6, %p1356_p9 }
  0x27   : > { %p1352_p11 = pneg %p1351_p8 }
  0x29   : > { %p1359_p10 = pnand %p1358_p5, %p1352_p11 }
  0x2b   : > { %1362 = shalt.err (!%p1359_p10)
}
  0x2c   : > { %s1465_s27 = smov 256   ;;  %s1466_s28 = smov 16  }
  0x2d   : > { %1265 = dma.hbm_to_vmem [thread:$0]  (!%p1580_p12), %s1940_s5, 2048, %s274_s23, [#allocation3], %s1465_s27, %s1465_s27, %s1466_s28  }
  0x2e   : > { %s1363_s22 = scalar_lea.hbm %s1942_s7, 4096 }
  0x2f   : > { %p1364_p13 = scmp.ne.s32.totalorder %s1942_s7, %s1363_s22  ;;  %p1370_p9 = scmp.lt.u32.totalorder %s1363_s22, %s1942_s7 }
  0x31   : > { %p1366_p5 = pnand %p1364_p13, %p1337_p0 }
  0x33   : > { %p1367_p6 = pneg %p1366_p5 }
  0x35   : > { %p1372_p10 = pnand %p1370_p9, %p1367_p6 }
  0x37   : > { %1375 = shalt.err (!%p1372_p10)
}
  0x38   : > { %s1376_s23 = scalar_lea.vmem %s1584_s26, 4096  ;;  %p1384_p4 = scmp.lt.s32.totalorder %s1584_s26, %s1584_s26 }
  0x39   : > { %p1377_p1 = scmp.ne.s32.totalorder %s1584_s26, %s1376_s23  ;;  %p1385_p7 = scmp.lt.s32.totalorder %s1376_s23, %s1376_s23 }
  0x3b   : > { %p1379_p2 = pnand %p1377_p1, %p1337_p0  ;;  %p1386_p8 = por %p1385_p7, %p1384_p4 }
  0x3d   : > { %p1380_p3 = pneg %p1379_p2 }
  0x3f   : > { %p1387_p11 = pnand %p1386_p8, %p1380_p3 }
  0x41   : > { %1390 = shalt.err (!%p1387_p11)
}
  0x42   : > { %s1467_s11 = smov 128   ;;  %s1468_s15 = smov 8  }
  0x43   : > { %1268 = dma.hbm_to_vmem [thread:$0]  (!%p1580_p12), %s1942_s7, 4096, %s1584_s26, [#allocation6], %s1467_s11, %s1467_s11, %s1468_s15  }
  0x44   : > { %p1958_p13 = scmp.ne.s32.totalorder %s1956_s21, 0 }
  0x45   : > { %p1959_p0 = scmp.eq.s32.totalorder (!%p1958_p13), %s1544_s13, 0 }
  0x46   : > { %317 = sbr.rel (%p1958_p13) target bundleno = 1041 (0x411), region = 56 }
  0x4d   : > { %1436 = dma.done.wait (%p1959_p0), [#allocation3], 2048   ;;  %p1960_p5 = pmov %p1959_p0 }
  0x4e   : > { %p1961_p6 = pmov %p1959_p0 }
  0x4f   : > { %1438 = vsyncadd (%p1960_p5), [#allocation3], 4294965248 }
  0x50   : > { %1440 = dma.done.wait (%p1961_p6), [#allocation6], 4096   ;;  %p1962_p9 = pmov %p1959_p0 }
  0x51   : > { %v1469_v0 = vmov 0.0   ;;  %v369_v1 = vld [vmem:[%s1936_s1 + $0x8] sm:$0xff]  ;;  %v371_v2 = vld [vmem:[%s1936_s1 + $0x18] sm:$0xff]  ;;  %v368_v3 = vld [vmem:[%s1936_s1] sm:$0xff]  ;;  %s1034_s21 = sshll.u32 %s1544_s13, 2  ;;  %vm665_vm0 = vcmask 523264  }
  0x52   : > { %1442 = vsyncadd (%p1962_p9), [#allocation6], 4294963200  ;;  %476 = vmatprep.mubr.f32.mxu0 %v1469_v0  ;;  %v1140_v4 = vpack.c.bf16 %v371_v2, %v369_v1  ;;  %v370_v5 = vld [vmem:[%s1936_s1 + $0x10] sm:$0xff]  ;;  %v373_v6 = vld [vmem:[%s1936_s1 + $0x28] sm:$0xff]  ;;  %p1761_p12 = scmp.lt.s32.totalorder %s1034_s21, 15  ;;  %s354_s11 = sand.u32 1, %s1453_s10  }
  0x53   : > { %v375_v7 = vld [vmem:[%s1936_s1 + $0x38] sm:$0xff]  ;;  %v1142_v8 = vpack.c.bf16 %v370_v5, %v368_v3  ;;  %v372_v10 = vld [vmem:[%s1936_s1 + $0x20] sm:$0xff]  ;;  %v374_v11 = vld [vmem:[%s1936_s1 + $0x30] sm:$0xff]  ;;  %s1894_s29 = scalar_lea.sflag [#allocation4], %s354_s11  ;;  %p1964_p1 = scmp.ne.s32.totalorder %s1954_s19, 0 }
  0x54   : > { %v1144_v9 = vpack.c.bf16 %v375_v7, %v373_v6  ;;  %v377_v12 = vld [vmem:[%s1936_s1 + $0x48] sm:$0xff]  ;;  %1141 = vmatprep.subr.bf16.mxu0 %v1140_v4  ;;  %v379_v13 = vld [vmem:[%s1936_s1 + $0x58] sm:$0xff]  ;;  %v1146_v14 = vpack.c.bf16 %v374_v11, %v372_v10  ;;  %v376_v16 = vld [vmem:[%s1936_s1 + $0x40] sm:$0xff]  ;;  %s1972_s21 = smov (!%p1761_p12, %s1034_s21), 15 }
  0x55   : > { %1143 = vmatpush1.bf16.msra.mxu0 %v1142_v8  ;;  %v1148_v15 = vpack.c.bf16 %v379_v13, %v377_v12  ;;  %v378_v17 = vld [vmem:[%s1936_s1 + $0x50] sm:$0xff]  ;;  %v381_v18 = vld [vmem:[%s1936_s1 + $0x68] sm:$0xff]  ;;  %v383_v19 = vld [vmem:[%s1936_s1 + $0x78] sm:$0xff]  ;;  %s1035_s14 = sshll.u32 %s1972_s21, 3  ;;  %s1033_s21 = sshll.u32 %s354_s11, 5 }
  0x56   : > { %1145 = vmatprep.subr.bf16.mxu0 %v1144_v9  ;;  %v1150_v20 = vpack.c.bf16 %v378_v17, %v376_v16  ;;  %v1152_v21 = vpack.c.bf16 %v383_v19, %v381_v18  ;;  %v380_v22 = vld [vmem:[%s1936_s1 + $0x60] sm:$0xff]  ;;  %v382_v23 = vld [vmem:[%s1936_s1 + $0x70] sm:$0xff]  ;;  %v385_v24 = vld [vmem:[%s1936_s1 + $0x88] sm:$0xff]  ;;  %s361_s15 = scalar_lea.vmem %s1935_s0, %s1035_s14  ;;  %s356_s28 = scalar_lea.vmem [#allocation7], %s1033_s21 }
  0x57   : > { %v387_v25 = vld [vmem:[%s1936_s1 + $0x98] sm:$0xff]  ;;  %v384_v26 = vld [vmem:[%s1936_s1 + $0x80] sm:$0xff]  ;;  %v386_v27 = vld [vmem:[%s1936_s1 + $0x90] sm:$0xff]  ;;  %v1154_v28 = vpack.c.bf16 %v382_v23, %v380_v22  ;;  %s941_s18 = sshll.u32 %s356_s28, 4  ;;  %s1892_s18 = int_to_ptr.vmem [resolvable:$true] %s941_s18 }
  0x58   : > { %v389_v29 = vld [vmem:[%s1936_s1 + $0xa8] sm:$0xff]  ;;  %v391_v30 = vld [vmem:[%s1936_s1 + $0xb8] sm:$0xff]  ;;  %v525_v31 = vld [vmem:[%s1938_s3 + $0x80] sm:$0xff]  ;;  %v1156_v34 = vpack.c.bf16 %v387_v25, %v385_v24  ;;  %v1158_v45 = vpack.c.bf16 %v386_v27, %v384_v26  ;;  %s1391_s16 = scalar_lea.vmem %s1892_s18, 512 }
  0x59   : > { %1147 = vmatpush1.bf16.msra.mxu0 %v1146_v14  ;;  %v526_v32 = vld [vmem:[%s1938_s3 + $0x88] sm:$0xff]  ;;  %v509_v33 = vld [vmem:[%s1938_s3] sm:$0xff]  ;;  %v527_v37 = vld [vmem:[%s1938_s3 + $0x90] sm:$0xff]  ;;  %v1160_v49 = vpack.c.bf16 %v391_v30, %v389_v29  ;;  %p1392_p10 = scmp.ne.s32.totalorder %s1892_s18, %s1391_s16 }
  0x5a   : > { %1149 = vmatprep.subr.bf16.mxu0 %v1148_v15  ;;  %v1172_v35 = vpack.c.bf16 %v526_v32, %v525_v31  ;;  %v510_v36 = vld [vmem:[%s1938_s3 + $0x8] sm:$0xff]  ;;  %v528_v38 = vld [vmem:[%s1938_s3 + $0x98] sm:$0xff]  ;;  %v511_v41 = vld [vmem:[%s1938_s3 + $0x10] sm:$0xff] }
  0x5b   : > { %v1174_v39 = vpack.c.bf16 %v510_v36, %v509_v33  ;;  %v1176_v40 = vpack.c.bf16 %v528_v38, %v527_v37  ;;  %v512_v42 = vld [vmem:[%s1938_s3 + $0x18] sm:$0xff]  ;;  %v529_v43 = vld [vmem:[%s1938_s3 + $0xa0] sm:$0xff]  ;;  %v530_v44 = vld [vmem:[%s1938_s3 + $0xa8] sm:$0xff]  ;;  %p1393_p2 = pnand %p1392_p10, %p1964_p1 }
  0x5c   : > { %1173 = vmatprep.subr.bf16.mxu1 %v1172_v35  ;;  %v388_v46 = vld [vmem:[%s1936_s1 + $0xa0] sm:$0xff]  ;;  %v390_v47 = vld [vmem:[%s1936_s1 + $0xb0] sm:$0xff]  ;;  %v1178_v48 = vpack.c.bf16 %v512_v42, %v511_v41  ;;  %v393_v50 = vld [vmem:[%s1936_s1 + $0xc8] sm:$0xff]  ;;  %v1180_v51 = vpack.c.bf16 %v530_v44, %v529_v43 }
  0x5d   : > { %1151 = vmatpush1.bf16.msra.mxu0 %v1150_v20  ;;  %1175 = vmatpush3.bf16.msra.mxu1 %v1174_v39  ;;  %v513_v52 = vld [vmem:[%s1938_s3 + $0x20] sm:$0xff]  ;;  %v514_v53 = vld [vmem:[%s1938_s3 + $0x28] sm:$0xff]  ;;  %v395_v54 = vld [vmem:[%s1936_s1 + $0xd8] sm:$0xff]  ;;  %v1162_v57 = vpack.c.bf16 %v390_v47, %v388_v46  ;;  %p1394_p3 = pneg %p1393_p2 }
  0x5e   : > { %1153 = vmatprep.subr.bf16.mxu0 %v1152_v21  ;;  %1177 = vmatprep.subr.bf16.mxu1 %v1176_v40  ;;  %v531_v55 = vld [vmem:[%s1938_s3 + $0xb0] sm:$0xff]  ;;  %v532_v56 = vld [vmem:[%s1938_s3 + $0xb8] sm:$0xff]  ;;  %v392_v58 = vld [vmem:[%s1936_s1 + $0xc0] sm:$0xff]  ;;  %v1182_v60 = vpack.c.bf16 %v514_v53, %v513_v52  ;;  %v1164_v61 = vpack.c.bf16 %v395_v54, %v393_v50  ;;  %v402_v53 = vlaneseq }
  0x5f   : > { %v394_v59 = vld [vmem:[%s1936_s1 + $0xd0] sm:$0xff]  ;;  %v397_v62 = vld [vmem:[%s1936_s1 + $0xe8] sm:$0xff]  ;;  %v1184_v63 = vpack.c.bf16 %v532_v56, %v531_v55  ;;  %v516_v2 = vld [vmem:[%s1938_s3 + $0x38] sm:$0xff] }
  0x60   : > { %v515_v1 = vld [vmem:[%s1938_s3 + $0x30] sm:$0xff]  ;;  %v399_v3 = vld [vmem:[%s1936_s1 + $0xf8] sm:$0xff]  ;;  %v533_v4 = vld [vmem:[%s1938_s3 + $0xc0] sm:$0xff]  ;;  %v1166_v6 = vpack.c.bf16 %v394_v59, %v392_v58  ;;  %v1854_v54 = vshrl.u32 %v402_v53, 7 }
  0x61   : > { %1155 = vmatpush1.bf16.msra.mxu0 %v1154_v28  ;;  %1179 = vmatpush3.bf16.msra.mxu1 %v1178_v48  ;;  %v534_v5 = vld [vmem:[%s1938_s3 + $0xc8] sm:$0xff]  ;;  %v396_v7 = vld [vmem:[%s1936_s1 + $0xe0] sm:$0xff]  ;;  %v1186_v8 = vpack.c.bf16 %v516_v2, %v515_v1  ;;  %v1168_v9 = vpack.c.bf16 %v399_v3, %v397_v62  ;;  %v398_v10 = vld [vmem:[%s1936_s1 + $0xf0] sm:$0xff] }
  0x62   : > { %1157 = vmatprep.subr.bf16.mxu0 %v1156_v34  ;;  %1181 = vmatprep.subr.bf16.mxu1 %v1180_v51  ;;  %v1188_v11 = vpack.c.bf16 %v534_v5, %v533_v4  ;;  %v517_v12 = vld [vmem:[%s1938_s3 + $0x40] sm:$0xff]  ;;  %v518_v13 = vld [vmem:[%s1938_s3 + $0x48] sm:$0xff]  ;;  %v535_v14 = vld [vmem:[%s1938_s3 + $0xd0] sm:$0xff]  ;;  %v1170_v16 = vpack.c.bf16 %v398_v10, %v396_v7  ;;  %v404_v55 = vsub.s32 0, %v1854_v54 }
  0x63   : > { %v536_v15 = vld [vmem:[%s1938_s3 + $0xd8] sm:$0xff]  ;;  %v1190_v17 = vpack.c.bf16 %v518_v13, %v517_v12  ;;  %v519_v19 = vld [vmem:[%s1938_s3 + $0x50] sm:$0xff]  ;;  %v537_v21 = vld [vmem:[%s1938_s3 + $0xe0] sm:$0xff] }
  0x64   : > { %v1192_v18 = vpack.c.bf16 %v536_v15, %v535_v14  ;;  %v520_v20 = vld [vmem:[%s1938_s3 + $0x58] sm:$0xff]  ;;  %v538_v22 = vld [vmem:[%s1938_s3 + $0xe8] sm:$0xff]  ;;  %v364_v23 = vld [vmem:[%s361_s15] sm:$0xff] }
  0x65   : > { %1159 = vmatpush1.bf16.msra.mxu0 %v1158_v45  ;;  %1183 = vmatpush3.bf16.msra.mxu1 %v1182_v60  ;;  %v1194_v24 = vpack.c.bf16 %v520_v20, %v519_v19  ;;  %v1196_v25 = vpack.c.bf16 %v538_v22, %v537_v21  ;;  %v365_v26 = vld [vmem:[%s361_s15 + $0x8] sm:$0xff]  ;;  %v366_v27 = vld [vmem:[%s361_s15 + $0x10] sm:$0xff]  ;;  %v367_v28 = vld [vmem:[%s361_s15 + $0x18] sm:$0xff]  ;;  %s1051_s15 = sshll.u32 %s1544_s13, 9  ;;  %s1470_s13 = smov [#allocation7]  }
  0x66   : > { %1161 = vmatprep.subr.bf16.mxu0 %v1160_v49  ;;  %1185 = vmatprep.subr.bf16.mxu1 %v1184_v63  ;;  %v521_v29 = vld [vmem:[%s1938_s3 + $0x60] sm:$0xff]  ;;  %v522_v30 = vld [vmem:[%s1938_s3 + $0x68] sm:$0xff]  ;;  %v539_v32 = vld [vmem:[%s1938_s3 + $0xf0] sm:$0xff]  ;;  %s1890_s26 = scalar_lea.hbm %s1944_s9, %s1051_s15  ;;  %s1395_s14 = sshll.u32 %s1470_s13, 4  ;;  %s1396_s14 = int_to_ptr.vmem [resolvable:$false] %s1395_s14 }
  0x67   : > { %v1198_v31 = vpack.c.bf16 %v522_v30, %v521_v29  ;;  %v540_v33 = vld [vmem:[%s1938_s3 + $0xf8] sm:$0xff]  ;;  %v523_v35 = vld [vmem:[%s1938_s3 + $0x70] sm:$0xff]  ;;  %v638_v38 = vld [vmem:[#allocation2 + $0x8] sm:$0xff]  ;;  %s1397_s17 = scalar_lea.vmem %s1396_s14, 1024  ;;  %p1398_p4 = scmp.lt.s32.totalorder %s1892_s18, %s1396_s14 }
  0x68   : > { %v1200_v34 = vpack.c.bf16 %v540_v33, %v539_v32  ;;  %v524_v36 = vld [vmem:[%s1938_s3 + $0x78] sm:$0xff]  ;;  %v637_v40 = vld [vmem:[#allocation2] sm:$0xff]  ;;  %v639_v42 = vld [vmem:[#allocation2 + $0x10] sm:$0xff]  ;;  %p1399_p7 = scmp.lt.s32.totalorder %s1397_s17, %s1391_s16 }
  0x69   : > { %1163 = vmatpush1.bf16.msra.mxu0 %v1162_v57  ;;  %1187 = vmatpush3.bf16.msra.mxu1 %v1186_v8  ;;  %v1202_v37 = vpack.c.bf16 %v524_v36, %v523_v35  ;;  %v640_v39 = vld [vmem:[#allocation2 + $0x18] sm:$0xff]  ;;  %v642_v43 = vld [vmem:[#allocation2 + $0x28] sm:$0xff]  ;;  %v1206_v45 = vpack.c.bf16 %v639_v42, %v637_v40  ;;  %v641_v47 = vld [vmem:[#allocation2 + $0x20] sm:$0xff]  ;;  %v408_v57 = vsub.s32 1, %v1854_v54 }
  0x6a   : > { %1165 = vmatprep.subr.bf16.mxu0 %v1164_v61  ;;  %1189 = vmatprep.subr.bf16.mxu1 %v1188_v11  ;;  %v1204_v41 = vpack.c.bf16 %v640_v39, %v638_v38  ;;  %v644_v44 = vld [vmem:[#allocation2 + $0x38] sm:$0xff]  ;;  %v643_v48 = vld [vmem:[#allocation2 + $0x30] sm:$0xff]  ;;  %v646_v49 = vld [vmem:[#allocation2 + $0x48] sm:$0xff]  ;;  %p1400_p8 = por %p1399_p7, %p1398_p4 }
  0x6b   : > { %v1208_v46 = vpack.c.bf16 %v644_v44, %v642_v43  ;;  %v648_v50 = vld [vmem:[#allocation2 + $0x58] sm:$0xff]  ;;  %v1210_v51 = vpack.c.bf16 %v643_v48, %v641_v47  ;;  %v400_v56 = vld [vmem:[%s1937_s2] sm:$0x3]  ;;  %v647_v22 = vld [vmem:[#allocation2 + $0x50] sm:$0xff] }
  0x6c   : > { %v1212_v52 = vpack.c.bf16 %v648_v50, %v646_v49  ;;  %v405_v58 = vrot.slane %v400_v56, %v404_v55  ;;  %v409_v59 = vrot.slane %v400_v56, %v408_v57  ;;  %v645_v21 = vld [vmem:[#allocation2 + $0x40] sm:$0xff]  ;;  %v793_v35 = vld [vmem:[#allocation5 + $0x90] sm:$0xff]  ;;  %v794_v36 = vld [vmem:[#allocation5 + $0x98] sm:$0xff]  ;;  %p1401_p11 = pnand %p1400_p8, %p1394_p3 }
  0x6d   : > { %1167 = vmatpush1.bf16.msra.mxu0 %v1166_v6  ;;  %1191 = vmatpush3.bf16.msra.mxu1 %v1190_v17  ;;  %v791_v30 = vld [vmem:[#allocation5 + $0x80] sm:$0xff]  ;;  %v1224_v38 = vpack.c.bf16 %v794_v36, %v793_v35  ;;  %v777_v39 = vld [vmem:[#allocation5 + $0x10] sm:$0xff]  ;;  %v778_v40 = vld [vmem:[#allocation5 + $0x18] sm:$0xff] }
  0x6e   : > { %1169 = vmatprep.subr.bf16.mxu0 %v1168_v9  ;;  %1193 = vmatprep.subr.bf16.mxu1 %v1192_v18  ;;  %v775_v32 = vld [vmem:[#allocation5] sm:$0xff]  ;;  %v796_v42 = vld [vmem:[#allocation5 + $0xa8] sm:$0xff]  ;;  %v1226_v43 = vpack.c.bf16 %v778_v40, %v777_v39  ;;  %v797_v47 = vld [vmem:[#allocation5 + $0xb0] sm:$0xff] }
  0x6f   : > { %v798_v48 = vld [vmem:[#allocation5 + $0xb8] sm:$0xff]  ;;  %v799_v53 = vld [vmem:[#allocation5 + $0xc0] sm:$0xff]  ;;  %v800_v56 = vld [vmem:[#allocation5 + $0xc8] sm:$0xff] }
  0x70   : > { %v1232_v50 = vpack.c.bf16 %v798_v48, %v797_v47  ;;  %v789_v36 = vld [vmem:[#allocation5 + $0x70] sm:$0xff]  ;;  %v653_v39 = vld [vmem:[%s1941_s6] sm:$0x3] }
  0x71   : > { %1171 = vmatpush1.bf16.msra.mxu0 %v1170_v16  ;;  %1195 = vmatpush3.bf16.msra.mxu1 %v1194_v24  ;;  %v650_v24 = vld [vmem:[#allocation2 + $0x68] sm:$0xff]  ;;  %v662_v40 = vrot.slane %v653_v39, %v408_v57 }
  0x72   : > { %1197 = vmatprep.subr.bf16.mxu1 %v1196_v25  ;;  %1205 = vmatprep.subr.bf16.mxu0 %v1204_v41  ;;  %v652_v25 = vld [vmem:[#allocation2 + $0x78] sm:$0xff]  ;;  %v795_v41 = vld [vmem:[#allocation5 + $0xa0] sm:$0xff] }
  0x73   : > { %v1228_v44 = vpack.c.bf16 %v796_v42, %v795_v41 }
  0x74   : > { %477 = vmatmul.mubr.f32.vlgmr.msra.gmra.mrb[0].mxu0 %v364_v23  ;;  %v1214_v23 = vpack.c.bf16 %v647_v22, %v645_v21 }
  0x75   : > { %482 = vmatprep.mubr.f32.mxu0 %v1469_v0  ;;  %1199 = vmatpush3.bf16.msra.mxu1 %v1198_v31  ;;  %v792_v31 = vld [vmem:[#allocation5 + $0x88] sm:$0xff] }
  0x76   : > { %1201 = vmatprep.subr.bf16.mxu1 %v1200_v34  ;;  %1207 = vmatpush1.bf16.msra.mxu0 %v1206_v45  ;;  %v1220_v33 = vpack.c.bf16 %v792_v31, %v791_v30  ;;  %v776_v34 = vld [vmem:[#allocation5 + $0x8] sm:$0xff]  ;;  %v779_v45 = vld [vmem:[#allocation5 + $0x20] sm:$0xff] }
  0x77   : > { %1209 = vmatprep.subr.bf16.mxu0 %v1208_v46  ;;  %v780_v46 = vld [vmem:[#allocation5 + $0x28] sm:$0xff]  ;;  %v787_v30 = vld [vmem:[#allocation5 + $0x60] sm:$0xff] }
  0x78   : > { %483 = vmatmul.mubr.f32.gmra.mrb[2].mxu0 %v365_v26  ;;  %v1216_v26 = vpack.c.bf16 %v652_v25, %v650_v24  ;;  %v1230_v49 = vpack.c.bf16 %v780_v46, %v779_v45  ;;  %v788_v31 = vld [vmem:[#allocation5 + $0x68] sm:$0xff] }
  0x79   : > { %488 = vmatprep.mubr.f32.mxu0 %v1469_v0  ;;  %1203 = vmatpush3.bf16.msra.mxu1 %v1202_v37  ;;  %v1222_v37 = vpack.c.bf16 %v776_v34, %v775_v32  ;;  %v1246_v32 = vpack.c.bf16 %v788_v31, %v787_v30  ;;  %v806_v34 = vld [vmem:[#allocation5 + $0xf8] sm:$0xff] }
  0x7a   : > { %1211 = vmatpush1.bf16.msra.mxu0 %v1210_v51  ;;  %1221 = vmatprep.subr.bf16.mxu1 %v1220_v33  ;;  %v781_v51 = vld [vmem:[#allocation5 + $0x30] sm:$0xff] }
  0x7b   : > { %1213 = vmatprep.subr.bf16.mxu0 %v1212_v52  ;;  %v782_v52 = vld [vmem:[#allocation5 + $0x38] sm:$0xff]  ;;  %v805_v33 = vld [vmem:[#allocation5 + $0xf0] sm:$0xff] }
  0x7c   : > { %489 = vmatmul.mubr.f32.gmra.mrb[4].mxu0 %v366_v27  ;;  %v649_v27 = vld [vmem:[#allocation2 + $0x60] sm:$0xff]  ;;  %v1248_v35 = vpack.c.bf16 %v806_v34, %v805_v33 }
  0x7d   : > { %494 = vmatprep.mubr.f32.mxu0 %v1469_v0 }
  0x7e   : > { %1215 = vmatpush1.bf16.msra.mxu0 %v1214_v23 }
  0x7f   : > { %1217 = vmatprep.subr.bf16.mxu0 %v1216_v26 }
  0x80   : > { %495 = vmatmul.mubr.f32.gmra.mrb[6].mxu0 %v367_v28  ;;  %v651_v28 = vld [vmem:[#allocation2 + $0x70] sm:$0xff] }
  0x81   : > { %742 = vmatprep.mubr.f32.mxu0 %v1469_v0  ;;  %v1218_v29 = vpack.c.bf16 %v651_v28, %v649_v27 }
  0x83   : > { %1219 = vmatpush1.bf16.msra.mxu0 %v1218_v29 }
 0x147   : > { %v478_v60 = vpop.f32.mrb[0].mxu0 }
 0x148   : > { %v479_v61 = vadd.f32 %v478_v60, %v405_v58  ;;  %v480_v62 = vpop.f32.mrb[1].mxu0  ;;  %v783_v60 = vld [vmem:[#allocation5 + $0x40] sm:$0xff] }
 0x149   : > { %v481_v63 = vadd.f32 %v480_v62, %v409_v59  ;;  %v801_v62 = vld [vmem:[#allocation5 + $0xd0] sm:$0xff] }
 0x14a   : > { %v501_v3 = vmax.f32 %v479_v61, 0.0  ;;  %v784_v61 = vld [vmem:[#allocation5 + $0x48] sm:$0xff] }
 0x14b   : > { %v484_v1 = vpop.f32.mrb[2].mxu0  ;;  %v502_v2 = vmax.f32 %v481_v63, 0.0  ;;  %v802_v63 = vld [vmem:[#allocation5 + $0xd8] sm:$0xff] }
 0x14c   : > { %v485_v4 = vadd.f32 %v484_v1, %v405_v58  ;;  %v486_v5 = vpop.f32.mrb[3].mxu0  ;;  %v1238_v1 = vpack.c.bf16 %v784_v61, %v783_v60 }
 0x14d   : > { %v487_v6 = vadd.f32 %v486_v5, %v409_v59  ;;  %612 = vmatprep.mubr.f32.mxu1 %v502_v2  ;;  %v1240_v2 = vpack.c.bf16 %v802_v63, %v801_v62  ;;  %v803_v5 = vld [vmem:[#allocation5 + $0xe0] sm:$0xff] }
 0x14e   : > { %613 = vmatmul.mubr.f32.vlgmr.msra.gmra.mrb[0].mxu1 %v501_v3  ;;  %v503_v9 = vmax.f32 %v485_v4, 0.0  ;;  %v785_v3 = vld [vmem:[#allocation5 + $0x50] sm:$0xff]  ;;  %v786_v4 = vld [vmem:[#allocation5 + $0x58] sm:$0xff] }
 0x14f   : > { %v504_v7 = vmax.f32 %v487_v6, 0.0  ;;  %v490_v8 = vpop.f32.mrb[4].mxu0  ;;  %1223 = vmatpush3.bf16.msra.mxu1 %v1222_v37  ;;  %v804_v6 = vld [vmem:[#allocation5 + $0xe8] sm:$0xff]  ;;  %v790_v37 = vld [vmem:[#allocation5 + $0x78] sm:$0xff] }
 0x150   : > { %v491_v10 = vadd.f32 %v490_v8, %v405_v58  ;;  %v492_v11 = vpop.f32.mrb[5].mxu0  ;;  %1225 = vmatprep.subr.bf16.mxu1 %v1224_v38  ;;  %v1244_v8 = vpack.c.bf16 %v804_v6, %v803_v5  ;;  %v1250_v38 = vpack.c.bf16 %v790_v37, %v789_v36 }
 0x151   : > { %v493_v12 = vadd.f32 %v492_v11, %v409_v59  ;;  %617 = vmatprep.mubr.f32.mxu1 %v504_v7  ;;  %v1242_v7 = vpack.c.bf16 %v786_v4, %v785_v3  ;;  %v1041_v3 = vld [vmem:[%s1943_s8] ss:$0 sm:$0xff] }
 0x152   : > { %618 = vmatmul.mubr.f32.gmra.mrb[2].mxu1 %v503_v9  ;;  %v505_v15 = vmax.f32 %v491_v10, 0.0  ;;  %v1036_v10 = vld [vmem:[%s1939_s4] ss:$0 sm:$0xff] }
 0x153   : > { %v506_v13 = vmax.f32 %v493_v12, 0.0  ;;  %v496_v14 = vpop.f32.mrb[6].mxu0  ;;  %1227 = vmatpush3.bf16.msra.mxu1 %v1226_v43 }
 0x154   : > { %v497_v16 = vadd.f32 %v496_v14, %v405_v58  ;;  %v498_v17 = vpop.f32.mrb[7].mxu0  ;;  %1229 = vmatprep.subr.bf16.mxu1 %v1228_v44  ;;  %v1234_v58 = vpack.c.bf16 %v782_v52, %v781_v51 }
 0x155   : > { %v499_v18 = vadd.f32 %v498_v17, %v409_v59  ;;  %622 = vmatprep.mubr.f32.mxu1 %v506_v13  ;;  %v1236_v59 = vpack.c.bf16 %v800_v56, %v799_v53 }
 0x156   : > { %623 = vmatmul.mubr.f32.gmra.mrb[4].mxu1 %v505_v15  ;;  %v507_v20 = vmax.f32 %v497_v16, 0.0 }
 0x157   : > { %v508_v19 = vmax.f32 %v499_v18, 0.0  ;;  %1231 = vmatpush3.bf16.msra.mxu1 %v1230_v49 }
 0x158   : > { %1233 = vmatprep.subr.bf16.mxu1 %v1232_v50 }
 0x159   : > { %627 = vmatprep.mubr.f32.mxu1 %v508_v19 }
 0x15a   : > { %628 = vmatmul.mubr.f32.gmra.mrb[6].mxu1 %v507_v20 }
 0x15b   : > { %1235 = vmatpush3.bf16.msra.mxu1 %v1234_v58 }
 0x15c   : > { %1237 = vmatprep.subr.bf16.mxu1 %v1236_v59 }
 0x15f   : > { %1239 = vmatpush3.bf16.msra.mxu1 %v1238_v1 }
 0x160   : > { %1241 = vmatprep.subr.bf16.mxu1 %v1240_v2 }
 0x163   : > { %1243 = vmatpush3.bf16.msra.mxu1 %v1242_v7 }
 0x164   : > { %1245 = vmatprep.subr.bf16.mxu1 %v1244_v8 }
 0x167   : > { %1247 = vmatpush3.bf16.msra.mxu1 %v1246_v32 }
 0x168   : > { %1249 = vmatprep.subr.bf16.mxu1 %v1248_v35 }
 0x16b   : > { %1251 = vmatpush3.bf16.msra.mxu1 %v1250_v38 }
 0x221   : > { %v1084_v9 = vpop.f32.mrb[0].mxu1 }
 0x222   : > { %v1085_v11 = vpop.f32.mrb[1].mxu1 }
 0x223   : > { %v1086_v12 = vadd.f32 %v1085_v11, %v1084_v9 }
 0x225   : > { %v615_v13 = vadd.f32 %v1086_v12, %v1036_v10  ;;  %v1087_v14 = vpop.f32.mrb[2].mxu1 }
 0x226   : > { %v1088_v15 = vpop.f32.mrb[3].mxu1 }
 0x227   : > { %v633_v16 = vmax.f32 %v615_v13, 0.0  ;;  %v1089_v17 = vadd.f32 %v1088_v15, %v1087_v14 }
 0x229   : > { %v620_v18 = vadd.f32 %v1089_v17, %v1036_v10  ;;  %v1090_v19 = vpop.f32.mrb[4].mxu1  ;;  %1037 = vmatmul.mubr.msk.f32.vlgmr.msra.gmra.mrb[8].mxu0 %vm665_vm0, %v633_v16 }
 0x22a   : > { %v1091_v20 = vpop.f32.mrb[5].mxu1  ;;  %748 = vmatprep.mubr.f32.mxu0 %v1469_v0 }
 0x22b   : > { %v634_v21 = vmax.f32 %v620_v18, 0.0  ;;  %v1092_v22 = vadd.f32 %v1091_v20, %v1090_v19 }
 0x22d   : > { %v625_v23 = vadd.f32 %v1092_v22, %v1036_v10  ;;  %v1093_v24 = vpop.f32.mrb[6].mxu1  ;;  %1038 = vmatmul.mubr.msk.f32.gmra.mrb[10].mxu0 %vm665_vm0, %v634_v21 }
 0x22e   : > { %v1094_v25 = vpop.f32.mrb[7].mxu1  ;;  %754 = vmatprep.mubr.f32.mxu0 %v1469_v0 }
 0x22f   : > { %v635_v26 = vmax.f32 %v625_v23, 0.0  ;;  %v1095_v27 = vadd.f32 %v1094_v25, %v1093_v24 }
 0x231   : > { %v630_v28 = vadd.f32 %v1095_v27, %v1036_v10  ;;  %1039 = vmatmul.mubr.msk.f32.gmra.mrb[12].mxu0 %vm665_vm0, %v635_v26 }
 0x232   : > { %760 = vmatprep.mubr.f32.mxu0 %v1469_v0  ;;  %v658_v0 = vrot.slane %v653_v39, %v404_v55 }
 0x233   : > { %v636_v29 = vmax.f32 %v630_v28, 0.0 }
 0x235   : > { %1040 = vmatmul.mubr.msk.f32.gmra.mrb[14].mxu0 %vm665_vm0, %v636_v29 }
 0x2fc   : > { %v744_v41 = vpop.f32.mrb[8].mxu0 }
 0x2fd   : > { %v745_v42 = vadd.f32 %v744_v41, %v658_v0  ;;  %v746_v43 = vpop.f32.mrb[9].mxu0 }
 0x2fe   : > { %v747_v44 = vadd.f32 %v746_v43, %v662_v40 }
 0x2ff   : > { %v767_v47 = vmax.f32 %v745_v42, 0.0 }
 0x300   : > { %v768_v45 = vmax.f32 %v747_v44, 0.0  ;;  %v750_v46 = vpop.f32.mrb[10].mxu0 }
 0x301   : > { %v751_v48 = vadd.f32 %v750_v46, %v658_v0  ;;  %v752_v49 = vpop.f32.mrb[11].mxu0 }
 0x302   : > { %v753_v50 = vadd.f32 %v752_v49, %v662_v40  ;;  %878 = vmatprep.mubr.f32.mxu1 %v768_v45 }
 0x303   : > { %879 = vmatmul.mubr.f32.vlgmr.msra.gmra.mrb[8].mxu1 %v767_v47  ;;  %v769_v53 = vmax.f32 %v751_v48, 0.0 }
 0x304   : > { %v770_v51 = vmax.f32 %v753_v50, 0.0  ;;  %v756_v52 = vpop.f32.mrb[12].mxu0 }
 0x305   : > { %v757_v56 = vadd.f32 %v756_v52, %v658_v0  ;;  %v758_v55 = vpop.f32.mrb[13].mxu0 }
 0x306   : > { %v759_v58 = vadd.f32 %v758_v55, %v662_v40  ;;  %883 = vmatprep.mubr.f32.mxu1 %v770_v51 }
 0x307   : > { %884 = vmatmul.mubr.f32.gmra.mrb[10].mxu1 %v769_v53  ;;  %v771_v59 = vmax.f32 %v757_v56, 0.0 }
 0x308   : > { %v772_v54 = vmax.f32 %v759_v58, 0.0  ;;  %v762_v57 = vpop.f32.mrb[14].mxu0 }
 0x309   : > { %v763_v60 = vadd.f32 %v762_v57, %v658_v0  ;;  %v764_v61 = vpop.f32.mrb[15].mxu0 }
 0x30a   : > { %v765_v62 = vadd.f32 %v764_v61, %v662_v40  ;;  %888 = vmatprep.mubr.f32.mxu1 %v772_v54 }
 0x30b   : > { %889 = vmatmul.mubr.f32.gmra.mrb[12].mxu1 %v771_v59  ;;  %v773_v1 = vmax.f32 %v763_v60, 0.0 }
 0x30c   : > { %v774_v63 = vmax.f32 %v765_v62, 0.0 }
 0x30e   : > { %893 = vmatprep.mubr.f32.mxu1 %v774_v63 }
 0x30f   : > { %894 = vmatmul.mubr.f32.gmra.mrb[14].mxu1 %v773_v1 }
 0x3d6   : > { %v1128_v2 = vpop.f32.mrb[8].mxu1 }
 0x3d7   : > { %v1129_v4 = vpop.f32.mrb[9].mxu1 }
 0x3d8   : > { %v1130_v5 = vadd.f32 %v1129_v4, %v1128_v2 }
 0x3da   : > { %v881_v6 = vadd.f32 %v1130_v5, %v1041_v3  ;;  %v1131_v7 = vpop.f32.mrb[10].mxu1 }
 0x3db   : > { %v1132_v8 = vpop.f32.mrb[11].mxu1 }
 0x3dc   : > { %v1042_v9 = vmul.f32 -1.442695, %v881_v6  ;;  %v1133_v10 = vadd.f32 %v1132_v8, %v1131_v7 }
 0x3de   : > { %1319 = vpow2.f32 %v1042_v9  ;;  %v886_v11 = vadd.f32 %v1133_v10, %v1041_v3  ;;  %v1134_v12 = vpop.f32.mrb[12].mxu1 }
 0x3df   : > { %v1135_v13 = vpop.f32.mrb[13].mxu1 }
 0x3e0   : > { %v1043_v14 = vmul.f32 -1.442695, %v886_v11  ;;  %v1136_v15 = vadd.f32 %v1135_v13, %v1134_v12 }
 0x3e2   : > { %1321 = vpow2.f32 %v1043_v14  ;;  %v891_v16 = vadd.f32 %v1136_v15, %v1041_v3  ;;  %v1137_v17 = vpop.f32.mrb[14].mxu1 }
 0x3e3   : > { %v1138_v18 = vpop.f32.mrb[15].mxu1 }
 0x3e4   : > { %v1044_v19 = vmul.f32 -1.442695, %v891_v16  ;;  %v1139_v20 = vadd.f32 %v1138_v18, %v1137_v17 }
 0x3e6   : > { %1323 = vpow2.f32 %v1044_v19  ;;  %v896_v21 = vadd.f32 %v1139_v20, %v1041_v3 }
 0x3e8   : > { %v1320_v22 = vpop.eup %1319  ;;  %v1045_v23 = vmul.f32 -1.442695, %v896_v21 }
 0x3e9   : > { %v911_v24 = vadd.f32 1.0, %v1320_v22 }
 0x3ea   : > { %1325 = vpow2.f32 %v1045_v23 }
 0x3eb   : > { %1327 = vrcp.f32 %v911_v24 }
 0x3ec   : > { %v1322_v25 = vpop.eup %1321 }
 0x3ed   : > { %v912_v26 = vadd.f32 1.0, %v1322_v25 }
 0x3ef   : > { %1329 = vrcp.f32 %v912_v26 }
 0x3f0   : > { %v1324_v27 = vpop.eup %1323 }
 0x3f1   : > { %v913_v28 = vadd.f32 1.0, %v1324_v27 }
 0x3f3   : > { %1331 = vrcp.f32 %v913_v28 }
 0x3f4   : > { %v1326_v29 = vpop.eup %1325 }
 0x3f5   : > { %v1328_v30 = vpop.eup %1327  ;;  %v914_v31 = vadd.f32 1.0, %v1326_v29 }
 0x3f6   : > { %923 = vst [vmem:[%s356_s28] sm:$0xff] %v1328_v30 }
 0x3f7   : > { %1333 = vrcp.f32 %v914_v31 }
 0x3f9   : > { %v1330_v32 = vpop.eup %1329 }
 0x3fa   : > { %924 = vst [vmem:[%s356_s28 + $0x8] sm:$0xff] %v1330_v32 }
 0x3fd   : > { %v1332_v33 = vpop.eup %1331 }
 0x3fe   : > { %925 = vst [vmem:[%s356_s28 + $0x10] sm:$0xff] %v1332_v33 }
 0x401   : > { %v1334_v34 = vpop.eup %1333 }
 0x402   : > { %926 = vst [vmem:[%s356_s28 + $0x18] sm:$0xff] %v1334_v34 }
 0x403   : > { %1404 = shalt.err (!%p1401_p11)
}
 0x404   : > { %s1405_s22 = scalar_lea.hbm %s1890_s26, 512  ;;  %s1409_s11 = scalar_lea.hbm %s1944_s9, 2048 }
 0x405   : > { %p1406_p13 = scmp.ne.s32.totalorder %s1890_s26, %s1405_s22  ;;  %p1410_p6 = scmp.lt.u32.totalorder %s1890_s26, %s1944_s9 }
 0x406   : > { %p1411_p9 = scmp.lt.u32.totalorder %s1409_s11, %s1405_s22  ;;  %p1413_p10 = scmp.lt.u32.totalorder %s1405_s22, %s1890_s26 }
 0x407   : > { %p1407_p0 = pnand %p1406_p13, %p1964_p1 }
 0x408   : > { %p1412_p12 = por %p1411_p9, %p1410_p6 }
 0x409   : > { %p1408_p5 = pneg %p1407_p0 }
 0x40a   : > { %p1414_p2 = por %p1413_p10, %p1412_p12 }
 0x40c   : > { %p1415_p3 = pnand %p1414_p2, %p1408_p5 }
 0x40e   : > { %1418 = shalt.err (!%p1415_p3)
}
 0x40f   : > { %s1471_s15 = smov 128   ;;  %s1472_s27 = smov 8  }
 0x410   : > { %1260 = dma.vmem_to_hbm [thread:$0]  (%p1964_p1), %s1892_s18, 512, %s1890_s26, %s1894_s29, %s1471_s15, %s1471_s15, %s1472_s27  }
 0x411 PF: > { %p1277_p4 = scmp.ge.s32.totalorder %s1461_s12, 2  ;;  %s956_s24 = sand.u32 1, %s1449_s30  }
 0x412   : > { %p1965_p7 = scmp.ne.s32.totalorder %s1955_s20, 0  ;;  %s957_s16 = scalar_lea.sflag [#allocation4], %s956_s24 }
 0x414   : > { %p1270_p8 = pnand %p1277_p4, %p1965_p7 }
 0x416   : > { %1444 = dma.done.wait (!%p1270_p8), %s957_s16, 512  }
 0x417   : > { %1446 = vsyncadd (!%p1270_p8), %s957_s16, 4294966784  ;;  %s1966_s12 = sld [smem:[#allocation12_spill]]  ;;  %s1967_s13 = sld [smem:[#allocation11_spill]] }
 0x418   : > { %s1968_s11 = sld [smem:[#allocation13_spill]]  ;;  %s1969_s30 = smov %s1453_s10 }
 0x41d   : > { %p21_p11 = scmp.ge.s32.totalorder %s1966_s12, 6   ;;  %s1970_s10 = smov %s1967_s13 }
 0x41f   :  { %23 = sbr.rel (!%p21_p11) target bundleno = 5 (0x5), region = 100 }
 0x426   :  { %962 = vsyncpa [#allocation3], 1 }
 0x427   :  { %964 = vsyncpa [#allocation3 + $0x1], 1 }
 0x428   :  { %965 = vsyncpa [#allocation6], 1 }
 0x429   :  { %966 = vsyncpa [#allocation4], 1 }
 0x42a   :  { %968 = vsyncpa [#allocation4 + $0x1], 1 }

</bundles_post_ra>
